<compile_context>
chip_gen: v7x
topology: tpu7x:2x2x1
jax: 0.10.0
libtpu: 0.0.40
codegen_flags: <defaults>
</compile_context>

<pallas_src>
import jax
import jax.numpy as jnp
from jax.experimental import pallas as pl
from jax.experimental.pallas import tpu as pltpu

HIDDEN_IN = 256
HIDDEN_OUT = 128
BN_EPS = 1e-5


def _round_up(n, m):
    return ((n + m - 1) // m) * m


def _topdnnfm_kernel(x_ref, w_ref, b_ref, o_ref):
    # Linear (BN already folded into w/b): [TM, 256] @ [256, 128] + [1, 128], then ReLU.
    z = jnp.dot(x_ref[...], w_ref[...], preferred_element_type=jnp.float32)
    o_ref[...] = jnp.maximum(z + b_ref[...], 0.0).astype(o_ref.dtype)


def topdnnfm_forward(x, w, b, gamma, beta, running_mean, running_var, *, block_b=512):
    """x: [B, 256]; w: [256, 128]; b/gamma/beta/mean/var: [1, 128]. Returns [B, 128]."""
    B = x.shape[0]

    # ---- Fold eval-mode BatchNorm into the linear parameters (outside the kernel) ----
    alpha = gamma * jax.lax.rsqrt(running_var + BN_EPS)      # (1, 128)
    w_folded = (w * alpha).astype(jnp.float32)               # (256, 128)
    b_folded = ((b - running_mean) * alpha + beta).astype(jnp.float32)  # (1, 128)

    # ---- Batch tiling: TM >= 8 (sublane alignment), capped at block_b ----
    tm = min(block_b, _round_up(B, 8))
    b_padded = _round_up(B, tm)
    if b_padded != B:
        x = jnp.pad(x, ((0, b_padded - B), (0, 0)))

    grid = (b_padded // tm,)

    out = pl.pallas_call(
        _topdnnfm_kernel,
        out_shape=jax.ShapeDtypeStruct((b_padded, HIDDEN_OUT), jnp.float32),
        grid=grid,
        in_specs=[
            # x: batch-tiled, double-buffered against HBM.
            pl.BlockSpec((tm, HIDDEN_IN), lambda i: (i, 0)),
            # Folded weight / bias: same block every iteration -> VMEM-resident.
            pl.BlockSpec((HIDDEN_IN, HIDDEN_OUT), lambda i: (0, 0)),
            pl.BlockSpec((1, HIDDEN_OUT), lambda i: (0, 0)),
        ],
        out_specs=pl.BlockSpec((tm, HIDDEN_OUT), lambda i: (i, 0)),
        compiler_params=pltpu.CompilerParams(
            dimension_semantics=("parallel",),  # lets v7x's 2 TCs split the batch tiles
        ),
    )(x, w_folded, b_folded)

    return out[:B]


def reference_forward(x, w, b, gamma, beta, running_mean, running_var):
    z = x @ w + b
    bn = gamma * (z - running_mean) / jnp.sqrt(running_var + BN_EPS) + beta
    return jnp.maximum(bn, 0.0)


if __name__ == "__main__":
    key = jax.random.PRNGKey(0)
    k_x, k_w, k_b, k_g, k_be, k_m, k_v, k_x2 = jax.random.split(key, 8)

    # Deterministic synthetic parameters (same shapes as nn.Linear(256,128) + nn.BatchNorm1d(128)).
    bound = 1.0 / jnp.sqrt(HIDDEN_IN)
    w = jax.random.uniform(k_w, (HIDDEN_IN, HIDDEN_OUT), minval=-bound, maxval=bound, dtype=jnp.float32)
    b = jax.random.uniform(k_b, (1, HIDDEN_OUT), minval=-bound, maxval=bound, dtype=jnp.float32)
    gamma = 1.0 + 0.1 * jax.random.normal(k_g, (1, HIDDEN_OUT), dtype=jnp.float32)
    beta = 0.1 * jax.random.normal(k_be, (1, HIDDEN_OUT), dtype=jnp.float32)
    running_mean = 0.1 * jax.random.normal(k_m, (1, HIDDEN_OUT), dtype=jnp.float32)
    running_var = 1.0 + 0.1 * jax.random.uniform(k_v, (1, HIDDEN_OUT), dtype=jnp.float32)

    # Small batch (single tile, tm = 8).
    B = 8
    x = jax.random.normal(k_x, (B, HIDDEN_IN), dtype=jnp.float32)
    out = jax.block_until_ready(topdnnfm_forward(x, w, b, gamma, beta, running_mean, running_var))
    ref = reference_forward(x, w, b, gamma, beta, running_mean, running_var)
    assert out.shape == (B, HIDDEN_OUT)
    assert jnp.allclose(out, ref, atol=1e-4, rtol=1e-4)

    # Non-multiple batch exercising the tiled grid + padding path (tm = 128, grid = 3).
    B2 = 300
    x2 = jax.random.normal(k_x2, (B2, HIDDEN_IN), dtype=jnp.float32)
    out2 = jax.block_until_ready(
        topdnnfm_forward(x2, w, b, gamma, beta, running_mean, running_var, block_b=128)
    )
    ref2 = reference_forward(x2, w, b, gamma, beta, running_mean, running_var)
    assert out2.shape == (B2, HIDDEN_OUT)
    assert jnp.allclose(out2, ref2, atol=1e-4, rtol=1e-4)

    print("KERNEL_OK")
</pallas_src>

<mosaic_0001>
module attributes {stable_mosaic.version = 11 : i64} {
  func.func @_topdnnfm_kernel(%arg0: i32, %arg1: memref<8x256xf32, #tpu.memory_space<vmem>>, %arg2: memref<256x128xf32, #tpu.memory_space<vmem>>, %arg3: memref<1x128xf32, #tpu.memory_space<vmem>>, %arg4: memref<8x128xf32, #tpu.memory_space<vmem>>) attributes {dimension_semantics = [#tpu.dimension_semantics<parallel>], iteration_bounds = array<i64: 1>, scalar_prefetch = 0 : i64, scratch_operands = 0 : i64, tpu.core_type = #tpu.core_type<tc>, window_params = [{transform_indices = @transform_0, window_bounds = array<i64: 8, 256>}, {pipeline_mode = #tpu.pipeline_mode<synchronous>, transform_indices = @transform_1, window_bounds = array<i64: 256, 128>}, {pipeline_mode = #tpu.pipeline_mode<synchronous>, transform_indices = @transform_2, window_bounds = array<i64: 1, 128>}, {transform_indices = @transform_3, window_bounds = array<i64: 8, 128>}]} {
    %c0 = arith.constant 0 : index
    %c0_0 = arith.constant 0 : index
    %0 = vector.load %arg1[%c0, %c0_0] : memref<8x256xf32, #tpu.memory_space<vmem>>, vector<8x256xf32>
    %c0_1 = arith.constant 0 : index
    %c0_2 = arith.constant 0 : index
    %1 = vector.load %arg2[%c0_1, %c0_2] : memref<256x128xf32, #tpu.memory_space<vmem>>, vector<256x128xf32>
    %cst = arith.constant dense<0.000000e+00> : vector<8x128xf32>
    %2 = tpu.matmul %0, %1, %cst {dimension_numbers = #tpu.dot_dimension_numbers<[1], [0], [0], [1], [0, 0, 1, 1], [], []>} : vector<8x256xf32>, vector<256x128xf32>, vector<8x128xf32> -> vector<8x128xf32>
    %c0_3 = arith.constant 0 : index
    %c0_4 = arith.constant 0 : index
    %3 = vector.load %arg3[%c0_3, %c0_4] : memref<1x128xf32, #tpu.memory_space<vmem>>, vector<1x128xf32>
    %4 = vector.broadcast %3 : vector<1x128xf32> to vector<8x128xf32>
    %5 = arith.addf %2, %4 : vector<8x128xf32>
    %cst_5 = arith.constant 0.000000e+00 : f32
    %6 = vector.broadcast %cst_5 : f32 to vector<8x128xf32>
    %7 = arith.maximumf %5, %6 : vector<8x128xf32>
    %c0_6 = arith.constant 0 : index
    %c0_7 = arith.constant 0 : index
    %8 = vector.load %arg4[%c0_6, %c0_7] : memref<8x128xf32, #tpu.memory_space<vmem>>, vector<8x128xf32>
    tpu.vector_store %arg4[%c0_6, %c0_7], %7 {strides = array<i32>} : memref<8x128xf32, #tpu.memory_space<vmem>>, vector<8x128xf32>,
    return
  }
  func.func @transform_0(%arg0: i32) -> (i32, i32) {
    %c0_i32 = arith.constant 0 : i32
    %c0_i32_0 = arith.constant 0 : i32
    return %arg0, %c0_i32 : i32, i32
  }
  func.func @transform_1(%arg0: i32) -> (i32, i32) {
    %c0_i32 = arith.constant 0 : i32
    %c0_i32_0 = arith.constant 0 : i32
    %c0_i32_1 = arith.constant 0 : i32
    return %c0_i32, %c0_i32_0 : i32, i32
  }
  func.func @transform_2(%arg0: i32) -> (i32, i32) {
    %c0_i32 = arith.constant 0 : i32
    %c0_i32_0 = arith.constant 0 : i32
    %c0_i32_1 = arith.constant 0 : i32
    return %c0_i32, %c0_i32_0 : i32, i32
  }
  func.func @transform_3(%arg0: i32) -> (i32, i32) {
    %c0_i32 = arith.constant 0 : i32
    %c0_i32_0 = arith.constant 0 : i32
    return %arg0, %c0_i32 : i32, i32
  }
}

</mosaic_0001>

<bundles_post_ra>
// kernel: tpu_custom_call.1
= control target key start
LH: loop header
LB: loop body
LE: loop exit
PB: predicated region body
PF: predicated region fallthrough
CT: control target
= control target key end

     0   :  { %8 = vsyncpa [#allocation3], 0  ;;  %s386_s0 = inlined_call_operand.hbm [shape: f32[8,256], index: 0, kind: input, shape index: {}]   ;;  %s387_s1 = inlined_call_operand.hbm [shape: f32[256,128], index: 1, kind: input, shape index: {}]   ;;  %s388_s2 = inlined_call_operand.vmem [shape: f32[1,128], index: 2, kind: input, shape index: {}]   ;;  %s389_s3 = inlined_call_operand.hbm [shape: f32[8,128], index: 3, kind: output, shape index: {}]  }
   0x1   :  { %9 = vsyncpa [#allocation6], 0 }
   0x2   :  { %10 = vsyncpa [#allocation4], 0  ;;  %s315_s12 = smov [#allocation2]   ;;  %s316_s14 = smov [#allocation5]  }
   0x3   :  { %s17_s13 = sshll.u32 %s315_s12, 4  ;;  %s26_s15 = sshll.u32 %s316_s14, 4  ;;  %s18_s13 = int_to_ptr.vmem [resolvable:$true] %s17_s13  ;;  %s340_s15 = int_to_ptr.vmem [resolvable:$true] %s26_s15 }
   0x4   :  { %s243_s18 = scalar_lea.hbm %s386_s0, 256 }
   0x5   :  { %p244_p0 = scmp.ne.s32.totalorder %s386_s0, %s243_s18  ;;  %p247_p1 = scmp.lt.u32.totalorder %s243_s18, %s386_s0 }
   0x7   :  { %p249_p2 = pnand %p247_p1, %p244_p0 }
   0x9   :  { %252 = shalt.err (!%p249_p2)
}
   0xa   :  { %s253_s23 = scalar_lea.vmem %s18_s13, 256  ;;  %p258_p4 = scmp.lt.s32.totalorder %s18_s13, %s18_s13 }
   0xb   :  { %p254_p3 = scmp.ne.s32.totalorder %s18_s13, %s253_s23  ;;  %p259_p5 = scmp.lt.s32.totalorder %s253_s23, %s253_s23 }
   0xd   :  { %p260_p6 = por %p259_p5, %p258_p4 }
   0xf   :  { %p261_p7 = pnand %p260_p6, %p254_p3 }
  0x11   :  { %264 = shalt.err (!%p261_p7)
}
  0x12   :  { %20 = dma.hbm_to_vmem [thread:$0]  %s386_s0, 256, %s18_s13, [#allocation3]  }
  0x13   :  { %s265_s28 = scalar_lea.hbm %s387_s1, 4096 }
  0x14   :  { %p266_p8 = scmp.ne.s32.totalorder %s387_s1, %s265_s28  ;;  %p269_p9 = scmp.lt.u32.totalorder %s265_s28, %s387_s1 }
  0x16   :  { %p271_p10 = pnand %p269_p9, %p266_p8 }
  0x18   :  { %274 = shalt.err (!%p271_p10)
}
  0x19   :  { %s275_s6 = scalar_lea.vmem %s340_s15, 4096  ;;  %p280_p12 = scmp.lt.s32.totalorder %s340_s15, %s340_s15 }
  0x1a   :  { %p276_p11 = scmp.ne.s32.totalorder %s340_s15, %s275_s6  ;;  %p281_p13 = scmp.lt.s32.totalorder %s275_s6, %s275_s6 }
  0x1c   :  { %p282_p0 = por %p281_p13, %p280_p12 }
  0x1e   :  { %p283_p1 = pnand %p282_p0, %p276_p11 }
  0x20   :  { %286 = shalt.err (!%p283_p1)
}
  0x21   :  { %s317_s0 = smov 128   ;;  %s318_s7 = smov 8  }
  0x22   :  { %32 = dma.hbm_to_vmem [thread:$0]  %s387_s1, 4096, %s340_s15, [#allocation6], %s317_s0, %s317_s0, %s318_s7  }
  0x23   :  { %309 = dma.done.wait [#allocation3], 256  }
  0x24   :  { %310 = vsyncadd [#allocation3], 4294967040 }
  0x25   :  { %311 = dma.done.wait [#allocation6], 4096  }
  0x26   :  { %312 = vsyncadd [#allocation6], 4294963200  ;;  %v59_v0 = vld [vmem:[#allocation5 + $0x80] sm:$0xff]  ;;  %v60_v1 = vld [vmem:[#allocation5 + $0x88] sm:$0xff]  ;;  %s319_s11 = smov [#allocation7]  }
  0x27   :  { %v43_v2 = vld [vmem:[#allocation5] sm:$0xff]  ;;  %v206_v3 = vpack.c.bf16 %v60_v1, %v59_v0  ;;  %v44_v4 = vld [vmem:[#allocation5 + $0x8] sm:$0xff]  ;;  %v61_v5 = vld [vmem:[#allocation5 + $0x90] sm:$0xff]  ;;  %s160_s12 = sshll.u32 %s319_s11, 4  ;;  %s161_s12 = int_to_ptr.vmem [resolvable:$true] %s160_s12 }
  0x28   :  { %v62_v6 = vld [vmem:[#allocation5 + $0x98] sm:$0xff]  ;;  %v208_v7 = vpack.c.bf16 %v44_v4, %v43_v2  ;;  %v45_v9 = vld [vmem:[#allocation5 + $0x10] sm:$0xff]  ;;  %v63_v11 = vld [vmem:[#allocation5 + $0xa0] sm:$0xff]  ;;  %s287_s13 = scalar_lea.vmem %s161_s12, 128  ;;  %p292_p3 = scmp.lt.s32.totalorder %s161_s12, %s161_s12 }
  0x29   :  { %v210_v8 = vpack.c.bf16 %v62_v6, %v61_v5  ;;  %v46_v10 = vld [vmem:[#allocation5 + $0x18] sm:$0xff]  ;;  %207 = vmatprep.subr.bf16.mxu0 %v206_v3  ;;  %v64_v12 = vld [vmem:[#allocation5 + $0xa8] sm:$0xff]  ;;  %v47_v15 = vld [vmem:[#allocation5 + $0x20] sm:$0xff]  ;;  %p288_p2 = scmp.ne.s32.totalorder %s161_s12, %s287_s13  ;;  %p293_p4 = scmp.lt.s32.totalorder %s287_s13, %s287_s13 }
  0x2a   :  { %209 = vmatpush3.bf16.msra.mxu0 %v208_v7  ;;  %v212_v13 = vpack.c.bf16 %v46_v10, %v45_v9  ;;  %v214_v14 = vpack.c.bf16 %v64_v12, %v63_v11  ;;  %v48_v16 = vld [vmem:[#allocation5 + $0x28] sm:$0xff]  ;;  %v65_v17 = vld [vmem:[#allocation5 + $0xb0] sm:$0xff]  ;;  %v66_v18 = vld [vmem:[#allocation5 + $0xb8] sm:$0xff] }
  0x2b   :  { %211 = vmatprep.subr.bf16.mxu0 %v210_v8  ;;  %v216_v19 = vpack.c.bf16 %v48_v16, %v47_v15  ;;  %v218_v20 = vpack.c.bf16 %v66_v18, %v65_v17  ;;  %v49_v21 = vld [vmem:[#allocation5 + $0x30] sm:$0xff]  ;;  %v50_v22 = vld [vmem:[#allocation5 + $0x38] sm:$0xff]  ;;  %v67_v23 = vld [vmem:[#allocation5 + $0xc0] sm:$0xff]  ;;  %p294_p5 = por %p293_p4, %p292_p3 }
  0x2c   :  { %v68_v24 = vld [vmem:[#allocation5 + $0xc8] sm:$0xff]  ;;  %v42_v25 = vld [vmem:[#allocation2 + $0x8] sm:$0xff]  ;;  %v220_v26 = vpack.c.bf16 %v50_v22, %v49_v21  ;;  %v51_v28 = vld [vmem:[#allocation5 + $0x40] sm:$0xff] }
  0x2d   :  { %146 = vmatprep.mubr.f32.mxu0 %v42_v25  ;;  %v222_v27 = vpack.c.bf16 %v68_v24, %v67_v23  ;;  %v52_v29 = vld [vmem:[#allocation5 + $0x48] sm:$0xff]  ;;  %v69_v30 = vld [vmem:[#allocation5 + $0xd0] sm:$0xff]  ;;  %v70_v31 = vld [vmem:[#allocation5 + $0xd8] sm:$0xff]  ;;  %p295_p6 = pnand %p294_p5, %p288_p2 }
  0x2e   :  { %213 = vmatpush3.bf16.msra.mxu0 %v212_v13  ;;  %v224_v32 = vpack.c.bf16 %v52_v29, %v51_v28  ;;  %v226_v33 = vpack.c.bf16 %v70_v31, %v69_v30  ;;  %v53_v34 = vld [vmem:[#allocation5 + $0x50] sm:$0xff]  ;;  %v54_v35 = vld [vmem:[#allocation5 + $0x58] sm:$0xff]  ;;  %v71_v36 = vld [vmem:[#allocation5 + $0xe0] sm:$0xff] }
  0x2f   :  { %215 = vmatprep.subr.bf16.mxu0 %v214_v14  ;;  %v72_v37 = vld [vmem:[#allocation5 + $0xe8] sm:$0xff]  ;;  %v228_v38 = vpack.c.bf16 %v54_v35, %v53_v34  ;;  %v55_v40 = vld [vmem:[#allocation5 + $0x60] sm:$0xff]  ;;  %v73_v42 = vld [vmem:[#allocation5 + $0xf0] sm:$0xff] }
  0x30   :  { %v230_v39 = vpack.c.bf16 %v72_v37, %v71_v36  ;;  %v56_v41 = vld [vmem:[#allocation5 + $0x68] sm:$0xff]  ;;  %v74_v43 = vld [vmem:[#allocation5 + $0xf8] sm:$0xff]  ;;  %v57_v46 = vld [vmem:[#allocation5 + $0x70] sm:$0xff] }
  0x31   :  { %v232_v44 = vpack.c.bf16 %v56_v41, %v55_v40  ;;  %v234_v45 = vpack.c.bf16 %v74_v43, %v73_v42  ;;  %v58_v47 = vld [vmem:[#allocation5 + $0x78] sm:$0xff]  ;;  %v41_v49 = vld [vmem:[#allocation2] sm:$0xff] }
  0x32   :  { %217 = vmatpush3.bf16.msra.mxu0 %v216_v19  ;;  %v236_v48 = vpack.c.bf16 %v58_v47, %v57_v46  ;;  %v170_v51 = vld [vmem:[%s388_s2] ss:$0 sm:$0xff] }
  0x33   :  { %219 = vmatprep.subr.bf16.mxu0 %v218_v20 }
  0x36   :  { %221 = vmatpush3.bf16.msra.mxu0 %v220_v26 }
  0x37   :  { %223 = vmatprep.subr.bf16.mxu0 %v222_v27 }
  0x3a   :  { %225 = vmatpush3.bf16.msra.mxu0 %v224_v32 }
  0x3b   :  { %227 = vmatprep.subr.bf16.mxu0 %v226_v33 }
  0x3e   :  { %229 = vmatpush3.bf16.msra.mxu0 %v228_v38 }
  0x3f   :  { %231 = vmatprep.subr.bf16.mxu0 %v230_v39 }
  0x42   :  { %233 = vmatpush3.bf16.msra.mxu0 %v232_v44 }
  0x43   :  { %235 = vmatprep.subr.bf16.mxu0 %v234_v45 }
  0x46   :  { %237 = vmatpush3.bf16.msra.mxu0 %v236_v48 }
  0x49   :  { %147 = vmatmul.mubr.f32.vlgmr.msra.gmra.mrb[0].mxu0 %v41_v49 }
 0x11c   :  { %v203_v50 = vpop.f32.mrb[0].mxu0 }
 0x11d   :  { %v204_v52 = vpop.f32.mrb[1].mxu0 }
 0x11e   :  { %v205_v53 = vadd.f32 %v204_v52, %v203_v50 }
 0x120   :  { %v149_v54 = vadd.f32 %v205_v53, %v170_v51 }
 0x122   :  { %v152_v55 = vmax.f32 %v149_v54, 0.0 }
 0x124   :  { %153 = vst [vmem:[#allocation7] sm:$0xff] %v152_v55 }
 0x125   :  { %298 = shalt.err (!%p295_p6)
}
 0x126   :  { %s299_s16 = scalar_lea.hbm %s389_s3, 128 }
 0x127   :  { %p300_p7 = scmp.ne.s32.totalorder %s389_s3, %s299_s16  ;;  %p303_p8 = scmp.lt.u32.totalorder %s299_s16, %s389_s3 }
 0x129   :  { %p305_p9 = pnand %p303_p8, %p300_p7 }
 0x12b   :  { %308 = shalt.err (!%p305_p9)
}
 0x12c   :  { %163 = dma.vmem_to_hbm [thread:$0]  %s161_s12, 128, %s389_s3, [#allocation4]  }
 0x12d   :  { %313 = dma.done.wait [#allocation4], 128  }
 0x12e   :  { %314 = vsyncadd [#allocation4], 4294967168 }
 0x12f   :  { %167 = vsyncpa [#allocation3], 1 }
 0x130   :  { %168 = vsyncpa [#allocation6], 1 }
 0x131   :  { %169 = vsyncpa [#allocation4], 1 }

</bundles_post_ra>
